<compile_context>
chip_gen: v6e
topology: v6e:2x2x1
jax: 0.10.0
libtpu: 0.0.40
codegen_flags: <defaults>
</compile_context>

<pallas_src>
import jax
import jax.numpy as jnp
from jax.experimental import pallas as pl
from jax.experimental.pallas import tpu as pltpu

D_IN, H1, H2, D_OUT = 784, 128, 256, 10
LATENCY_B = 256                    # below this, a single fused call (no grid) is the latency floor
VMEM_LIMIT = 32 * 1024 * 1024      # safe scoped-VMEM budget on v5e/v6e/v7x


def mlp_kernel(x_ref, w1_ref, b1_ref, w2_ref, b2_ref, w3_ref, b3_ref, o_ref):
    # Layer 1: Linear(784 -> 128) + ReLU.  x cast to bf16 in-kernel (cheap VPU pack,
    # hidden under DMA); f32 MXU accumulation.
    x = x_ref[...].astype(jnp.bfloat16)
    h1 = jnp.dot(x, w1_ref[...], preferred_element_type=jnp.float32)
    h1 = jnp.maximum(h1 + b1_ref[...], 0.0)
    # Layer 2: Linear(128 -> 256) + ReLU.
    h2 = jnp.dot(h1.astype(jnp.bfloat16), w2_ref[...],
                 preferred_element_type=jnp.float32)
    h2 = jnp.maximum(h2 + b2_ref[...], 0.0)
    # Output layer: Linear(256 -> 10), no activation.  N=10 lives in one (masked) vreg.
    out = jnp.dot(h2.astype(jnp.bfloat16), w3_ref[...],
                  preferred_element_type=jnp.float32)
    o_ref[...] = (out + b3_ref[...]).astype(o_ref.dtype)


def prepare_params(params):
    """One-time weight preparation (cast matmul operands to bf16). Call once, reuse."""
    w1 = params["w1"].astype(jnp.bfloat16)   # (784, 128)
    w2 = params["w2"].astype(jnp.bfloat16)   # (128, 256)
    w3 = params["w3"].astype(jnp.bfloat16)   # (256, 10)
    b1 = params["b1"].astype(jnp.float32)    # (1, 128)
    b2 = params["b2"].astype(jnp.float32)    # (1, 256)
    b3 = params["b3"].astype(jnp.float32)    # (1, 10)
    return (w1, b1, w2, b2, w3, b3)


def _round_up(n, m):
    return -(-n // m) * m


def mnist_nn_forward(x, prepared, *, bm=1024):
    """x: [B, 784] float32.  prepared: output of prepare_params()."""
    B, d_in = x.shape
    assert d_in == D_IN
    w1, b1, w2, b2, w3, b3 = prepared

    if B <= LATENCY_B:
        # Latency path: no grid, whole problem fused in a single invocation.
        return pl.pallas_call(
            mlp_kernel,
            out_shape=jax.ShapeDtypeStruct((B, D_OUT), jnp.float32),
            compiler_params=pltpu.CompilerParams(vmem_limit_bytes=VMEM_LIMIT),
        )(x, w1, b1, w2, b2, w3, b3)

    # Throughput path: 1-D "parallel" batch grid.
    #  - big tiles amortize per-step overhead on single-TC v5e/v6e,
    #  - but cap so there are always >= 2 steps to shard across v7x's two TCs.
    bm_eff = max(8, min(_round_up(bm, 8), _round_up(pl.cdiv(B, 2), 8)))
    grid = (pl.cdiv(B, bm_eff),)
    full = lambda shape: pl.BlockSpec(shape, lambda i: (0, 0))  # invariant -> stays resident

    return pl.pallas_call(
        mlp_kernel,
        out_shape=jax.ShapeDtypeStruct((B, D_OUT), jnp.float32),
        grid_spec=pltpu.PrefetchScalarGridSpec(
            num_scalar_prefetch=0,
            grid=grid,
            in_specs=[
                pl.BlockSpec((bm_eff, D_IN), lambda i: (i, 0)),  # x batch tile (f32)
                full(w1.shape), full(b1.shape),
                full(w2.shape), full(b2.shape),
                full(w3.shape), full(b3.shape),
            ],
            out_specs=pl.BlockSpec((bm_eff, D_OUT), lambda i: (i, 0)),
        ),
        compiler_params=pltpu.CompilerParams(
            dimension_semantics=("parallel",),
            vmem_limit_bytes=VMEM_LIMIT,
        ),
    )(x, w1, b1, w2, b2, w3, b3)


def init_params(key):
    """Deterministic init matching PyTorch nn.Linear (uniform +-1/sqrt(fan_in))."""
    def linear(key, fan_in, fan_out):
        kw, kb = jax.random.split(key)
        bound = 1.0 / jnp.sqrt(fan_in)
        w = jax.random.uniform(kw, (fan_in, fan_out), jnp.float32, -bound, bound)
        b = jax.random.uniform(kb, (1, fan_out), jnp.float32, -bound, bound)
        return w, b

    k1, k2, k3 = jax.random.split(key, 3)
    w1, b1 = linear(k1, D_IN, H1)
    w2, b2 = linear(k2, H1, H2)
    w3, b3 = linear(k3, H2, D_OUT)
    return {"w1": w1, "b1": b1, "w2": w2, "b2": b2, "w3": w3, "b3": b3}


def reference_forward(x, p):
    # Reference with the same bf16 operand quantization (f32 math elsewhere).
    bf = lambda a: a.astype(jnp.bfloat16).astype(jnp.float32)
    h1 = jnp.maximum(bf(x) @ bf(p["w1"]) + p["b1"], 0.0)
    h2 = jnp.maximum(bf(h1) @ bf(p["w2"]) + p["b2"], 0.0)
    return bf(h2) @ bf(p["w3"]) + p["b3"]


if __name__ == "__main__":
    key = jax.random.PRNGKey(0)
    kx1, kx2, kp = jax.random.split(key, 3)
    params = init_params(kp)
    prepared = prepare_params(params)   # one-time weight cast, reused across calls

    fwd = jax.jit(mnist_nn_forward)

    # Small-batch / latency path (no grid, single fused invocation).
    B_small = 8
    x_small = jax.random.normal(kx1, (B_small, D_IN), jnp.float32)
    out_small = jax.block_until_ready(fwd(x_small, prepared))
    ref_small = reference_forward(x_small, params)
    assert out_small.shape == (B_small, D_OUT)
    assert jnp.allclose(out_small, ref_small, atol=2e-2, rtol=2e-2)

    # Throughput path: >= 2 grid steps (keeps both v7x TensorCores busy).
    B_big = 512
    x_big = jax.random.normal(kx2, (B_big, D_IN), jnp.float32)
    out_big = jax.block_until_ready(fwd(x_big, prepared))
    ref_big = reference_forward(x_big, params)
    assert out_big.shape == (B_big, D_OUT)
    assert jnp.allclose(out_big, ref_big, atol=2e-2, rtol=2e-2)

    print("KERNEL_OK")
</pallas_src>

<mosaic_0001>
module attributes {stable_mosaic.version = 11 : i64} {
  func.func @mlp_kernel(%arg0: memref<8x784xf32, #tpu.memory_space<vmem>>, %arg1: memref<784x128xbf16, #tpu.memory_space<vmem>>, %arg2: memref<1x128xf32, #tpu.memory_space<vmem>>, %arg3: memref<128x256xbf16, #tpu.memory_space<vmem>>, %arg4: memref<1x256xf32, #tpu.memory_space<vmem>>, %arg5: memref<256x10xbf16, #tpu.memory_space<vmem>>, %arg6: memref<1x10xf32, #tpu.memory_space<vmem>>, %arg7: memref<8x10xf32, #tpu.memory_space<vmem>>) attributes {dimension_semantics = [], scalar_prefetch = 0 : i64, scratch_operands = 0 : i64, tpu.core_type = #tpu.core_type<tc>} {
    %c0 = arith.constant 0 : index
    %c0_0 = arith.constant 0 : index
    %0 = vector.load %arg0[%c0, %c0_0] : memref<8x784xf32, #tpu.memory_space<vmem>>, vector<8x784xf32>
    %1 = arith.truncf %0 : vector<8x784xf32> to vector<8x784xbf16>
    %c0_1 = arith.constant 0 : index
    %c0_2 = arith.constant 0 : index
    %2 = vector.load %arg1[%c0_1, %c0_2] : memref<784x128xbf16, #tpu.memory_space<vmem>>, vector<784x128xbf16>
    %cst = arith.constant dense<0.000000e+00> : vector<8x128xf32>
    %3 = tpu.matmul %1, %2, %cst {dimension_numbers = #tpu.dot_dimension_numbers<[1], [0], [0], [1], [0, 0, 1, 1], [], []>} : vector<8x784xbf16>, vector<784x128xbf16>, vector<8x128xf32> -> vector<8x128xf32>
    %c0_3 = arith.constant 0 : index
    %c0_4 = arith.constant 0 : index
    %4 = vector.load %arg2[%c0_3, %c0_4] : memref<1x128xf32, #tpu.memory_space<vmem>>, vector<1x128xf32>
    %5 = vector.broadcast %4 : vector<1x128xf32> to vector<8x128xf32>
    %6 = arith.addf %3, %5 : vector<8x128xf32>
    %cst_5 = arith.constant 0.000000e+00 : f32
    %7 = vector.broadcast %cst_5 : f32 to vector<8x128xf32>
    %8 = arith.maximumf %6, %7 : vector<8x128xf32>
    %9 = arith.truncf %8 : vector<8x128xf32> to vector<8x128xbf16>
    %c0_6 = arith.constant 0 : index
    %c0_7 = arith.constant 0 : index
    %10 = vector.load %arg3[%c0_6, %c0_7] : memref<128x256xbf16, #tpu.memory_space<vmem>>, vector<128x256xbf16>
    %cst_8 = arith.constant dense<0.000000e+00> : vector<8x256xf32>
    %11 = tpu.matmul %9, %10, %cst_8 {dimension_numbers = #tpu.dot_dimension_numbers<[1], [0], [0], [1], [0, 0, 1, 1], [], []>} : vector<8x128xbf16>, vector<128x256xbf16>, vector<8x256xf32> -> vector<8x256xf32>
    %c0_9 = arith.constant 0 : index
    %c0_10 = arith.constant 0 : index
    %12 = vector.load %arg4[%c0_9, %c0_10] : memref<1x256xf32, #tpu.memory_space<vmem>>, vector<1x256xf32>
    %13 = vector.broadcast %12 : vector<1x256xf32> to vector<8x256xf32>
    %14 = arith.addf %11, %13 : vector<8x256xf32>
    %cst_11 = arith.constant 0.000000e+00 : f32
    %15 = vector.broadcast %cst_11 : f32 to vector<8x256xf32>
    %16 = arith.maximumf %14, %15 : vector<8x256xf32>
    %17 = arith.truncf %16 : vector<8x256xf32> to vector<8x256xbf16>
    %c0_12 = arith.constant 0 : index
    %c0_13 = arith.constant 0 : index
    %18 = vector.load %arg5[%c0_12, %c0_13] : memref<256x10xbf16, #tpu.memory_space<vmem>>, vector<256x10xbf16>
    %cst_14 = arith.constant dense<0.000000e+00> : vector<8x10xf32>
    %19 = tpu.matmul %17, %18, %cst_14 {dimension_numbers = #tpu.dot_dimension_numbers<[1], [0], [0], [1], [0, 0, 1, 1], [], []>} : vector<8x256xbf16>, vector<256x10xbf16>, vector<8x10xf32> -> vector<8x10xf32>
    %c0_15 = arith.constant 0 : index
    %c0_16 = arith.constant 0 : index
    %20 = vector.load %arg6[%c0_15, %c0_16] : memref<1x10xf32, #tpu.memory_space<vmem>>, vector<1x10xf32>
    %21 = vector.broadcast %20 : vector<1x10xf32> to vector<8x10xf32>
    %22 = arith.addf %19, %21 : vector<8x10xf32>
    %c0_17 = arith.constant 0 : index
    %c0_18 = arith.constant 0 : index
    %23 = vector.load %arg7[%c0_17, %c0_18] : memref<8x10xf32, #tpu.memory_space<vmem>>, vector<8x10xf32>
    tpu.vector_store %arg7[%c0_17, %c0_18], %22 {strides = array<i32>} : memref<8x10xf32, #tpu.memory_space<vmem>>, vector<8x10xf32>,
    return
  }
}

</mosaic_0001>

<bundles_post_ra>
// kernel: mnist_nn_forward.1
= control target key start
LH: loop header
LB: loop body
LE: loop exit
PB: predicated region body
PF: predicated region fallthrough
CT: control target
= control target key end

     0   :  { %12 = vsyncpa [#allocation3], 0  ;;  %s1484_s0 = inlined_call_operand.hbm [shape: f32[8,784], index: 0, kind: input, shape index: {}]   ;;  %s1485_s1 = inlined_call_operand.hbm [shape: bf16[784,128], index: 1, kind: input, shape index: {}]   ;;  %s1486_s2 = inlined_call_operand.vmem [shape: f32[1,128], index: 2, kind: input, shape index: {}]   ;;  %s1487_s3 = inlined_call_operand.vmem [shape: bf16[128,256], index: 3, kind: input, shape index: {}]   ;;  %s1488_s4 = inlined_call_operand.vmem [shape: f32[1,256], index: 4, kind: input, shape index: {}]   ;;  %s1489_s5 = inlined_call_operand.vmem [shape: bf16[256,10], index: 5, kind: input, shape index: {}]   ;;  %s1490_s6 = inlined_call_operand.vmem [shape: f32[1,10], index: 6, kind: input, shape index: {}]   ;;  %s1491_s7 = inlined_call_operand.hbm [shape: f32[8,10], index: 7, kind: output, shape index: {}]  }
   0x1   :  { %13 = vsyncpa [#allocation6], 0 }
   0x2   :  { %14 = vsyncpa [#allocation4], 0  ;;  %s1322_s24 = smov [#allocation2]   ;;  %s1323_s26 = smov [#allocation5]  }
   0x3   :  { %s21_s25 = sshll.u32 %s1322_s24, 4  ;;  %s30_s27 = sshll.u32 %s1323_s26, 4  ;;  %s22_s25 = int_to_ptr.vmem [resolvable:$true] %s21_s25  ;;  %s31_s27 = int_to_ptr.vmem [resolvable:$true] %s30_s27 }
   0x4   :  { %s1264_s28 = scalar_lea.vmem %s22_s25, 896  ;;  %p1269_p1 = scmp.lt.s32.totalorder %s22_s25, %s22_s25 }
   0x5   :  { %p1265_p0 = scmp.ne.s32.totalorder %s22_s25, %s1264_s28  ;;  %p1270_p2 = scmp.lt.s32.totalorder %s1264_s28, %s1264_s28 }
   0x7   :  { %p1271_p3 = por %p1270_p2, %p1269_p1 }
   0x9   :  { %p1272_p4 = pnand %p1271_p3, %p1265_p0 }
   0xb   :  { %1275 = shalt.err (!%p1272_p4)
}
   0xc   :  { %24 = dma.hbm_to_vmem [thread:$0]  %s1484_s0, 896, %s22_s25, [#allocation3]  }
   0xd   :  { %s1284_s8 = scalar_lea.vmem %s31_s27, 6272  ;;  %p1289_p6 = scmp.lt.s32.totalorder %s31_s27, %s31_s27 }
   0xe   :  { %p1285_p5 = scmp.ne.s32.totalorder %s31_s27, %s1284_s8  ;;  %p1290_p7 = scmp.lt.s32.totalorder %s1284_s8, %s1284_s8 }
  0x10   :  { %p1291_p8 = por %p1290_p7, %p1289_p6 }
  0x12   :  { %p1292_p9 = pnand %p1291_p8, %p1285_p5 }
  0x14   :  { %1295 = shalt.err (!%p1292_p9)
}
  0x15   :  { %s1324_s9 = smov 64   ;;  %s1325_s10 = smov 4  }
  0x16   :  { %36 = dma.hbm_to_vmem [thread:$0]  %s1485_s1, 6272, %s31_s27, [#allocation6], %s1324_s9, %s1324_s9, %s1325_s10  }
  0x17   :  { %1316 = dma.done.wait [#allocation3], 896  }
  0x18   :  { %1317 = vsyncadd [#allocation3], 4294966400 }
  0x19   :  { %1318 = dma.done.wait [#allocation6], 6272  }
  0x1a   :  { %1319 = vsyncadd [#allocation6], 4294961024  ;;  %v1167_v0 = vld [vmem:[#allocation5 + $0x78] sm:$0xff]   ;;  %v1171_v4 = vld [vmem:[#allocation5 + $0x70] sm:$0xff]   ;;  %v1326_v44 = vmov 0.0   ;;  %vm1327_vm0 = vmmov 0  }
  0x1b   :  { %v1168_v1 = vld [vmem:[#allocation5 + $0x38] sm:$0xff]   ;;  %1063 = vmatprep.subr.bf16.mxu0 %v1167_v0  ;;  %v1172_v5 = vld [vmem:[#allocation5 + $0x30] sm:$0xff]   ;;  %v1175_v8 = vld [vmem:[#allocation5 + $0x68] sm:$0xff]   ;;  %vm467_vm1 = vcmask 130048   ;;  %vm961_vm2 = vcmask 80896  }
  0x1c   :  { %v1169_v2 = vld [vmem:[#allocation5 + $0xf8] sm:$0xff]   ;;  %1064 = vmatpush3.bf16.msra.mxu0 %v1168_v1  ;;  %v1173_v6 = vld [vmem:[#allocation5 + $0xf0] sm:$0xff]   ;;  %v1176_v9 = vld [vmem:[#allocation5 + $0x28] sm:$0xff]  }
  0x1d   :  { %v1170_v3 = vld [vmem:[#allocation5 + $0xb8] sm:$0xff]   ;;  %1085 = vmatprep.subr.bf16.mxu1 %v1169_v2  ;;  %1065 = vmatprep.subr.bf16.mxu0 %v1171_v4  ;;  %v1174_v7 = vld [vmem:[#allocation5 + $0xb0] sm:$0xff]   ;;  %v1177_v10 = vld [vmem:[#allocation5 + $0xe8] sm:$0xff]  }
  0x1e   :  { %1086 = vmatpush3.bf16.msra.mxu1 %v1170_v3  ;;  %v1178_v11 = vld [vmem:[#allocation5 + $0xa8] sm:$0xff]   ;;  %v1179_v12 = vld [vmem:[#allocation5 + $0x60] sm:$0xff]   ;;  %v1183_v16 = vld [vmem:[#allocation5 + $0x58] sm:$0xff]  }
  0x1f   :  { %1087 = vmatprep.subr.bf16.mxu1 %v1173_v6  ;;  %v1180_v13 = vld [vmem:[#allocation5 + $0x20] sm:$0xff]   ;;  %v1184_v17 = vld [vmem:[#allocation5 + $0x18] sm:$0xff]   ;;  %v1187_v20 = vld [vmem:[#allocation5 + $0x50] sm:$0xff]  }
  0x20   :  { %1066 = vmatpush3.bf16.msra.mxu0 %v1172_v5  ;;  %v1181_v14 = vld [vmem:[#allocation5 + $0xe0] sm:$0xff]   ;;  %v1185_v18 = vld [vmem:[#allocation5 + $0xd8] sm:$0xff]   ;;  %v1188_v21 = vld [vmem:[#allocation5 + $0x10] sm:$0xff]  }
  0x21   :  { %1067 = vmatprep.subr.bf16.mxu0 %v1175_v8  ;;  %v1182_v15 = vld [vmem:[#allocation5 + $0xa0] sm:$0xff]   ;;  %v1186_v19 = vld [vmem:[#allocation5 + $0x98] sm:$0xff]   ;;  %v1189_v22 = vld [vmem:[#allocation5 + $0xd0] sm:$0xff]  }
  0x22   :  { %1088 = vmatpush3.bf16.msra.mxu1 %v1174_v7  ;;  %v1190_v23 = vld [vmem:[#allocation5 + $0x90] sm:$0xff]   ;;  %v1191_v24 = vld [vmem:[#allocation5 + $0x48] sm:$0xff]   ;;  %v1195_v28 = vld [vmem:[#allocation5 + $0x40] sm:$0xff]  }
  0x23   :  { %1089 = vmatprep.subr.bf16.mxu1 %v1177_v10  ;;  %v1192_v25 = vld [vmem:[#allocation5 + $0x8] sm:$0xff]   ;;  %v1196_v29 = vld [vmem:[#allocation5] sm:$0xff]   ;;  %v55_v31 = vld [vmem:[#allocation2 + $0x8] sm:$0xff] }
  0x24   :  { %1068 = vmatpush3.bf16.msra.mxu0 %v1176_v9  ;;  %v1193_v26 = vld [vmem:[#allocation5 + $0xc8] sm:$0xff]   ;;  %v1197_v30 = vld [vmem:[#allocation5 + $0xc0] sm:$0xff]   ;;  %v62_v32 = vpack.c.bf16 %v55_v31, %v55_v31  ;;  %v1199_v36 = vld [vmem:[#allocation5 + $0x178] sm:$0xff]  }
  0x25   :  { %1069 = vmatprep.subr.bf16.mxu0 %v1179_v12  ;;  %v1194_v27 = vld [vmem:[#allocation5 + $0x88] sm:$0xff]   ;;  %v1198_v33 = vld [vmem:[#allocation5 + $0x80] sm:$0xff]   ;;  %v1200_v39 = vld [vmem:[#allocation5 + $0x138] sm:$0xff]  }
  0x26   :  { %1090 = vmatpush3.bf16.msra.mxu1 %v1178_v11  ;;  %v54_v34 = vld [vmem:[#allocation2] sm:$0xff]  ;;  %v57_v37 = vld [vmem:[#allocation2 + $0x18] sm:$0xff]  ;;  %503 = vmatprep.mubr.bf16.mxu0 %v62_v32  ;;  %v56_v40 = vld [vmem:[#allocation2 + $0x10] sm:$0xff] }
  0x27   :  { %1091 = vmatprep.subr.bf16.mxu1 %v1181_v14  ;;  %v61_v35 = vpack.c.bf16 %v54_v34, %v54_v34  ;;  %v64_v38 = vpack.c.bf16 %v57_v37, %v57_v37  ;;  %v63_v41 = vpack.c.bf16 %v56_v40, %v56_v40  ;;  %v1201_v42 = vld [vmem:[#allocation5 + $0x170] sm:$0xff]   ;;  %v1203_v45 = vld [vmem:[#allocation5 + $0x168] sm:$0xff]   ;;  %v1205_v47 = vld [vmem:[#allocation5 + $0x160] sm:$0xff]  }
  0x28   :  { %1070 = vmatpush3.bf16.msra.mxu0 %v1180_v13  ;;  %v1202_v43 = vld [vmem:[#allocation5 + $0x130] sm:$0xff]   ;;  %v1204_v46 = vld [vmem:[#allocation5 + $0x128] sm:$0xff]   ;;  %v1206_v48 = vld [vmem:[#allocation5 + $0x120] sm:$0xff]  }
  0x29   :  { %1071 = vmatprep.subr.bf16.mxu0 %v1183_v16  ;;  %543 = vmatprep.mubr.bf16.mxu1 %v64_v38  ;;  %v1207_v49 = vld [vmem:[#allocation5 + $0x158] sm:$0xff]   ;;  %v1209_v51 = vld [vmem:[#allocation5 + $0x150] sm:$0xff]   ;;  %v1215_v53 = vld [vmem:[#allocation5 + $0x180] sm:$0xff]   ;;  %v1328_v16 = vmov 0  }
  0x2a   :  { %1092 = vmatpush3.bf16.msra.mxu1 %v1182_v15  ;;  %v1208_v50 = vld [vmem:[#allocation5 + $0x118] sm:$0xff]   ;;  %v1210_v52 = vld [vmem:[#allocation5 + $0x110] sm:$0xff]   ;;  %v1211_v55 = vld [vmem:[#allocation5 + $0x148] sm:$0xff]  }
  0x2b   :  { %1093 = vmatprep.subr.bf16.mxu1 %v1185_v18  ;;  %v59_v54 = vld [vmem:[#allocation2 + $0x28] sm:$0xff]  ;;  %v60_v57 = vld [vmem:[#allocation2 + $0x30] sm:$0xff]  ;;  %v1212_v59 = vld [vmem:[#allocation5 + $0x108] sm:$0xff]  }
  0x2c   :  { %1072 = vmatpush3.bf16.msra.mxu0 %v1184_v17  ;;  %v66_v56 = vpack.c.bf16 %v59_v54, %v59_v54  ;;  %v67_v58 = vpack.c.bf16 %v60_v57, %v60_v57  ;;  %v1213_v60 = vld [vmem:[#allocation5 + $0x140] sm:$0xff]   ;;  %v58_v62 = vld [vmem:[#allocation2 + $0x20] sm:$0xff] }
  0x2d   :  { %1073 = vmatprep.subr.bf16.mxu0 %v1187_v20  ;;  %v1214_v61 = vld [vmem:[#allocation5 + $0x100] sm:$0xff]   ;;  %v65_v63 = vpack.c.bf16 %v58_v62, %v58_v62  ;;  %v1221_v2 = vld [vmem:[%s1487_s3 + $0x64] ss:$8 sps:$4 sm:$0xff]   ;;  %v1219_v3 = vld [vmem:[%s1487_s3 + $0x60] ss:$8 sps:$4 sm:$0xff]  }
  0x2e   :  { %1094 = vmatpush3.bf16.msra.mxu1 %v1186_v19  ;;  %v1216_v0 = vld [vmem:[%s1487_s3 + $0x70] ss:$8 sps:$4 sm:$0xff]   ;;  %v1218_v1 = vld [vmem:[%s1487_s3 + $0x74] ss:$8 sps:$4 sm:$0xff]   ;;  %v1227_v6 = vld [vmem:[%s1487_s3 + $0x44] ss:$8 sps:$4 sm:$0xff]  }
  0x2f   :  { %1095 = vmatprep.subr.bf16.mxu1 %v1189_v22  ;;  %v1224_v4 = vld [vmem:[%s1487_s3 + $0x54] ss:$8 sps:$4 sm:$0xff]   ;;  %v1222_v5 = vld [vmem:[%s1487_s3 + $0x50] ss:$8 sps:$4 sm:$0xff]   ;;  %v1225_v7 = vld [vmem:[%s1487_s3 + $0x40] ss:$8 sps:$4 sm:$0xff]  }
  0x30   :  { %1074 = vmatpush3.bf16.msra.mxu0 %v1188_v21  ;;  %v1230_v8 = vld [vmem:[%s1487_s3 + $0x34] ss:$8 sps:$4 sm:$0xff]   ;;  %v1228_v9 = vld [vmem:[%s1487_s3 + $0x30] ss:$8 sps:$4 sm:$0xff]   ;;  %v1231_v10 = vld [vmem:[%s1487_s3 + $0x20] ss:$8 sps:$4 sm:$0xff]  }
  0x31   :  { %1075 = vmatprep.subr.bf16.mxu0 %v1191_v24  ;;  %v1233_v11 = vld [vmem:[%s1487_s3 + $0x24] ss:$8 sps:$4 sm:$0xff]   ;;  %v1236_v12 = vld [vmem:[%s1487_s3 + $0x14] ss:$8 sps:$4 sm:$0xff]   ;;  %v1234_v13 = vld [vmem:[%s1487_s3 + $0x10] ss:$8 sps:$4 sm:$0xff]  }
  0x32   :  { %1096 = vmatpush3.bf16.msra.mxu1 %v1190_v23  ;;  %v1239_v14 = vld [vmem:[%s1487_s3 + $0x4] ss:$8 sps:$4 sm:$0xff]   ;;  %v1237_v15 = vld [vmem:[%s1487_s3] ss:$8 sps:$4 sm:$0xff]   ;;  %v1240_v17 = vld [vmem:[%s1489_s5 + $0x78] sm:$0xff]  }
  0x33   :  { %1097 = vmatprep.subr.bf16.mxu1 %v1193_v26  ;;  %v1241_v18 = vld [vmem:[%s1489_s5 + $0x38] sm:$0xff]   ;;  %v1242_v19 = vld [vmem:[%s1489_s5 + $0x70] sm:$0xff]   ;;  %v1244_v21 = vld [vmem:[%s1489_s5 + $0x68] sm:$0xff]  }
  0x34   :  { %1076 = vmatpush3.bf16.msra.mxu0 %v1192_v25  ;;  %v1243_v20 = vld [vmem:[%s1489_s5 + $0x30] sm:$0xff]   ;;  %v1245_v22 = vld [vmem:[%s1489_s5 + $0x28] sm:$0xff]   ;;  %v1246_v23 = vld [vmem:[%s1489_s5 + $0x60] sm:$0xff]  }
  0x35   :  { %1077 = vmatprep.subr.bf16.mxu0 %v1195_v28  ;;  %v1247_v24 = vld [vmem:[%s1489_s5 + $0x20] sm:$0xff]   ;;  %v1248_v25 = vld [vmem:[%s1489_s5 + $0x58] sm:$0xff]   ;;  %v1251_v28 = vld [vmem:[%s1489_s5 + $0x10] sm:$0xff]  }
  0x36   :  { %1098 = vmatpush3.bf16.msra.mxu1 %v1194_v27  ;;  %v1249_v26 = vld [vmem:[%s1489_s5 + $0x18] sm:$0xff]   ;;  %v1250_v27 = vld [vmem:[%s1489_s5 + $0x50] sm:$0xff]   ;;  %v1254_v57 = vld [vmem:[%s1489_s5 + $0x40] sm:$0xff]  }
  0x37   :  { %1099 = vmatprep.subr.bf16.mxu1 %v1197_v30  ;;  %v649_v62 = vld [vmem:[%s1488_s4] sm:$0x3]  ;;  %s1329_s4 = smov [#allocation7]  }
  0x38   :  { %1078 = vmatpush3.bf16.msra.mxu0 %v1196_v29  ;;  %s969_s27 = sshll.u32 %s1329_s4, 4  ;;  %s970_s27 = int_to_ptr.vmem [resolvable:$true] %s969_s27 }
  0x39   :  { %1107 = vmatprep.subr.bf16.mxu0 %v1199_v36  ;;  %s1296_s28 = scalar_lea.vmem %s970_s27, 128  ;;  %p1301_p11 = scmp.lt.s32.totalorder %s970_s27, %s970_s27 }
  0x3a   :  { %1100 = vmatpush3.bf16.msra.mxu1 %v1198_v33  ;;  %p1297_p10 = scmp.ne.s32.totalorder %s970_s27, %s1296_s28  ;;  %p1302_p12 = scmp.lt.s32.totalorder %s1296_s28, %s1296_s28 }
  0x3b   :  { %504 = vmatmul.mubr.bf16.vlgmr.msra.gmra.mxu0 %v61_v35  ;;  %1153 = vmatprep.subr.bf16.mxu1 %v1326_v44 }
  0x3c   :  { %1108 = vmatpush3.bf16.msra.mxu0 %v1200_v39  ;;  %583 = vmatprep.mubr.bf16.mxu0 %v66_v56  ;;  %v1253_v56 = vld [vmem:[%s1489_s5 + $0x8] sm:$0xff]   ;;  %p1303_p13 = por %p1302_p12, %p1301_p11 }
  0x3d   :  { %544 = vmatmul.mubr.bf16.vlgmr.msra.gmra.mxu1 %v63_v41  ;;  %1109 = vmatprep.subr.bf16.mxu0 %v1201_v42  ;;  %v979_v42 = vld [vmem:[%s1486_s2] ss:$0 sm:$0xff] }
  0x3e   :  { %1155 = vmatprep.mubr.msk.bf16.mxu1 %vm1327_vm0, %v1326_v44  ;;  %1154 = vmatpush3.bf16.msra.mxu1 %v1215_v53  ;;  %p1304_p0 = pnand %p1303_p13, %p1297_p10 }
  0x3f   :  { %741 = vmatprep.subr.bf16.mxu1 %v1218_v1 }
  0x40   :  { %1110 = vmatpush3.bf16.msra.mxu0 %v1202_v43 }
  0x41   :  { %1111 = vmatprep.subr.bf16.mxu0 %v1203_v45 }
  0x44   :  { %1112 = vmatpush3.bf16.msra.mxu0 %v1204_v46 }
  0x45   :  { %1113 = vmatprep.subr.bf16.mxu0 %v1205_v47  ;;  %1156 = vmatmul.mubr.msk.bf16.vlgmr.msra.gmra.mxu1 %vm467_vm1, %v67_v58  ;;  %v1255_v58 = vld [vmem:[%s1489_s5] sm:$0xff]  }
  0x46   :  { %742 = vmatpush1.bf16.msra.mxu1 %v1216_v0  ;;  %773 = vmatprep.mubr.bf16.mxu1 %v1328_v16 }
  0x47   :  { %743 = vmatprep.subr.bf16.mxu1 %v1221_v2 }
  0x48   :  { %1114 = vmatpush3.bf16.msra.mxu0 %v1206_v48 }
  0x49   :  { %1115 = vmatprep.subr.bf16.mxu0 %v1207_v49 }
  0x4a   :  { %744 = vmatpush1.bf16.msra.mxu1 %v1219_v3 }
  0x4b   :  { %745 = vmatprep.subr.bf16.mxu1 %v1224_v4 }
  0x4c   :  { %1116 = vmatpush3.bf16.msra.mxu0 %v1208_v50 }
  0x4d   :  { %1117 = vmatprep.subr.bf16.mxu0 %v1209_v51 }
  0x4e   :  { %746 = vmatpush1.bf16.msra.mxu1 %v1222_v5 }
  0x4f   :  { %747 = vmatprep.subr.bf16.mxu1 %v1227_v6 }
  0x50   :  { %1118 = vmatpush3.bf16.msra.mxu0 %v1210_v52 }
  0x51   :  { %1119 = vmatprep.subr.bf16.mxu0 %v1211_v55  ;;  %v1252_v55 = vld [vmem:[%s1489_s5 + $0x48] sm:$0xff]  }
  0x52   :  { %748 = vmatpush1.bf16.msra.mxu1 %v1225_v7 }
  0x53   :  { %749 = vmatprep.subr.bf16.mxu1 %v1230_v8 }
  0x54   :  { %1120 = vmatpush3.bf16.msra.mxu0 %v1212_v59  ;;  %v651_v59 = vlaneseq }
  0x55   :  { %1121 = vmatprep.subr.bf16.mxu0 %v1213_v60 }
  0x56   :  { %750 = vmatpush1.bf16.msra.mxu1 %v1228_v9  ;;  %v652_v60 = vshrl.u32 %v651_v59, 7 }
  0x57   :  { %751 = vmatprep.subr.bf16.mxu1 %v1233_v11 }
  0x58   :  { %1122 = vmatpush3.bf16.msra.mxu0 %v1214_v61  ;;  %v653_v61 = vsub.s32 0, %v652_v60 }
  0x59   :  { %1131 = vmatprep.subr.bf16.mxu0 %v1240_v17 }
  0x5a   :  { %752 = vmatpush1.bf16.msra.mxu1 %v1231_v10  ;;  %v654_v0 = vrot.slane %v649_v62, %v653_v61 }
  0x5b   :  { %584 = vmatmul.mubr.bf16.vlgmr.msra.gmra.mxu0 %v65_v63  ;;  %753 = vmatprep.subr.bf16.mxu1 %v1236_v12  ;;  %v657_v63 = vsub.s32 1, %v652_v60 }
  0x5c   :  { %1132 = vmatpush3.bf16.msra.mxu0 %v1241_v18 }
  0x5d   :  { %1133 = vmatprep.subr.bf16.mxu0 %v1242_v19  ;;  %v658_v1 = vrot.slane %v649_v62, %v657_v63 }
  0x5e   :  { %754 = vmatpush1.bf16.msra.mxu1 %v1234_v13  ;;  %v1046_v13 = vld [vmem:[%s1490_s6] ss:$0 sm:$0xff] }
  0x5f   :  { %755 = vmatprep.subr.bf16.mxu1 %v1239_v14 }
  0x60   :  { %1134 = vmatpush3.bf16.msra.mxu0 %v1243_v20 }
  0x61   :  { %1135 = vmatprep.subr.bf16.mxu0 %v1244_v21 }
  0x62   :  { %756 = vmatpush1.bf16.msra.mxu1 %v1237_v15 }
  0x64   :  { %1136 = vmatpush3.bf16.msra.mxu0 %v1245_v22 }
  0x65   :  { %1137 = vmatprep.subr.bf16.mxu0 %v1246_v23 }
  0x68   :  { %1138 = vmatpush3.bf16.msra.mxu0 %v1247_v24 }
  0x69   :  { %1139 = vmatprep.subr.bf16.mxu0 %v1248_v25 }
  0x6c   :  { %1140 = vmatpush3.bf16.msra.mxu0 %v1249_v26 }
  0x6d   :  { %1141 = vmatprep.subr.bf16.mxu0 %v1250_v27 }
  0x70   :  { %1142 = vmatpush3.bf16.msra.mxu0 %v1251_v28 }
  0x71   :  { %1143 = vmatprep.subr.bf16.mxu0 %v1252_v55 }
  0x74   :  { %1144 = vmatpush3.bf16.msra.mxu0 %v1253_v56 }
  0x75   :  { %1145 = vmatprep.subr.bf16.mxu0 %v1254_v57 }
  0x78   :  { %1146 = vmatpush3.bf16.msra.mxu0 %v1255_v58 }
  0xfb   :  { %v1079_v29 = vpop.f32.mrf.mxu0 }
  0xfd   :  { %v1080_v30 = vpop.f32.mrf.mxu0  ;;  %v1101_v31 = vpop.f32.mrf.mxu1 }
  0xfe   :  { %v1081_v41 = vadd.f32 %v1080_v30, %v1079_v29 }
  0xff   :  { %v1082_v32 = vpop.f32.mrf.mxu0  ;;  %v1102_v33 = vpop.f32.mrf.mxu1 }
 0x100   :  { %v506_v43 = vadd.f32 %v1081_v41, %v979_v42  ;;  %v1103_v44 = vadd.f32 %v1102_v33, %v1101_v31 }
 0x101   :  { %v1083_v34 = vpop.f32.mrf.mxu0  ;;  %v1104_v35 = vpop.f32.mrf.mxu1 }
 0x102   :  { %v546_v47 = vadd.f32 %v1103_v44, %v506_v43 }
 0x103   :  { %v1105_v36 = vpop.f32.mrf.mxu1 }
 0x105   :  { %v625_v37 = vpop.f32.mrf.mxu1 }
 0x107   :  { %v1157_v38 = vpop.f32.mrf.mxu1 }
 0x109   :  { %v628_v39 = vpop.f32.mrf.mxu1 }
 0x10b   :  { %v1158_v40 = vpop.f32.mrf.mxu1 }
 0x11b   :  { %v1123_v45 = vpop.f32.mrf.mxu0 }
 0x11d   :  { %v1124_v46 = vpop.f32.mrf.mxu0 }
 0x11e   :  { %v1125_v48 = vadd.f32 %v1124_v46, %v1123_v45 }
 0x11f   :  { %v1126_v49 = vpop.f32.mrf.mxu0 }
 0x120   :  { %v586_v50 = vadd.f32 %v1125_v48, %v546_v47 }
 0x121   :  { %v1127_v51 = vpop.f32.mrf.mxu0 }
 0x122   :  { %v626_v52 = vadd.f32 %v625_v37, %v586_v50 }
 0x124   :  { %v631_v53 = vmax.f32 %v626_v52, 0.0 }
 0x126   :  { %v632_v54 = vpack.c.bf16 %v631_v53, %v631_v53 }
 0x128   :  { %774 = vmatmul.mubr.bf16.vlgmr.msra.gmra.mxu1 %v632_v54 }
 0x1e8   :  { %v775_v2 = vpop.f32.mrf.mxu1 }
 0x1e9   :  { %v776_v3 = vadd.f32 %v775_v2, %v654_v0 }
 0x1ea   :  { %v777_v4 = vpop.f32.mrf.mxu1 }
 0x1eb   :  { %v778_v5 = vadd.f32 %v777_v4, %v658_v1  ;;  %v782_v6 = vmax.f32 %v776_v3, 0.0 }
 0x1ec   :  { %v779_v7 = vpop.f32.mrf.mxu1 }
 0x1ed   :  { %v783_v8 = vmax.f32 %v778_v5, 0.0  ;;  %v784_v11 = vpack.c.bf16 %v782_v6, %v782_v6 }
 0x1ee   :  { %v780_v9 = vpop.f32.mrf.mxu1 }
 0x1ef   :  { %v785_v10 = vpack.c.bf16 %v783_v8, %v783_v8 }
 0x1f1   :  { %953 = vmatprep.mubr.bf16.mxu0 %v785_v10 }
 0x1f2   :  { %954 = vmatmul.mubr.bf16.vlgmr.msra.gmra.mxu0 %v784_v11 }
 0x2b2   :  { %v1147_v12 = vpop.f32.mrf.mxu0 }
 0x2b4   :  { %v1148_v14 = vpop.f32.mrf.mxu0 }
 0x2b5   :  { %v1149_v15 = vadd.f32 %v1148_v14, %v1147_v12 }
 0x2b6   :  { %v1150_v16 = vpop.f32.mrf.mxu0 }
 0x2b7   :  { %v956_v17 = vadd.f32 %v1149_v15, %v1046_v13 }
 0x2b8   :  { %v1151_v18 = vpop.f32.mrf.mxu0 }
 0x2b9   :  { %962 = vst.msk [vmem:[#allocation7] sm:$0xff] %vm961_vm2, %v956_v17 }
 0x2ba   :  { %1307 = shalt.err (!%p1304_p0)
}
 0x2bb   :  { %972 = dma.vmem_to_hbm [thread:$0]  %s970_s27, 128, %s1491_s7, [#allocation4]  }
 0x2bc   :  { %1320 = dma.done.wait [#allocation4], 128  }
 0x2bd   :  { %1321 = vsyncadd [#allocation4], 4294967168 }
 0x2be   :  { %976 = vsyncpa [#allocation3], 1 }
 0x2bf   :  { %977 = vsyncpa [#allocation6], 1 }
 0x2c0   :  { %978 = vsyncpa [#allocation4], 1 }

</bundles_post_ra>
